<compile_context>
chip_gen: v6e
topology: v6e:2x2x1
jax: 0.10.0
libtpu: 0.0.40
codegen_flags: <defaults>
</compile_context>

<pallas_src>
import functools

import jax
import jax.numpy as jnp
from jax.experimental import pallas as pl
from jax.experimental.pallas import tpu as pltpu

TIME_WIN = 5    # conv1 kernel = (1, 5)
L1_OUT = 32     # conv1 output channels
L2_OUT = 64     # conv2 output channels
FC1_OUT = 128   # fc1 output features


# ---------------------------------------------------------------------------
# Fused Pallas kernel: conv1+relu, conv2+relu, flatten, fc1+relu, fc2+sigmoid
# ---------------------------------------------------------------------------
def _fused_kernel(pT_ref, w1b_ref, b1b_ref, w2_ref, b2_ref,
                  wfc1_ref, bfc1_ref, wfc2_ref, bfc2_ref,
                  out_ref, y_scr, *, batch, tprime):
    """
    pT_ref  : (B*T', 5*H)    im2col patches, row=(b,t), col=(k,h)
    w1b_ref : (5*H, 32*H)    block-diag conv1 weight, col=(o,g)
    b1b_ref : (1, 32*H)
    w2_ref  : (32*H, 64)     conv2 weight, row=(o,g)
    b2_ref  : (1, 64)
    wfc1_ref: (T'*64, 128)   fc1 weight, rows reordered to (t,c)
    bfc1_ref: (1, 128)
    wfc2_ref: (1, 128)
    bfc2_ref: (1, 1)
    out_ref : (B, 1)
    y_scr   : (B, T'*64)     VMEM scratch for the lane-dense flattened conv out
    """
    # conv1 + relu : one MXU matmul with K = 5*H, lanes = 32*H (=128)
    a1 = jnp.dot(pT_ref[...], w1b_ref[...], preferred_element_type=jnp.float32)
    a1 = jnp.maximum(a1 + b1b_ref[...], 0.0)                  # (B*T', 128)

    # conv2 + relu : one MXU matmul with K = 32*H (=128)
    a2 = jnp.dot(a1, w2_ref[...], preferred_element_type=jnp.float32)
    a2 = jnp.maximum(a2 + b2_ref[...], 0.0)                   # (B*T', 64)

    # flatten (b, t, c) -> (b, t*64 + c) into a lane-dense VMEM scratch
    for b in range(batch):
        for t in range(tprime):
            r = b * tprime + t
            y_scr[pl.ds(b, 1), pl.ds(t * L2_OUT, L2_OUT)] = a2[r:r + 1, :]

    # fc1 + relu : (B, 768) @ (768, 128)
    h1 = jnp.dot(y_scr[...], wfc1_ref[...], preferred_element_type=jnp.float32)
    h1 = jnp.maximum(h1 + bfc1_ref[...], 0.0)                 # (B, 128)

    # fc2 as a VPU lane-reduction (avoid an N=1 MXU matmul), then sigmoid
    z = jnp.sum(h1 * wfc2_ref[...], axis=-1, keepdims=True) + bfc2_ref[...]
    out_ref[...] = jax.nn.sigmoid(z)                          # (B, 1)


# ---------------------------------------------------------------------------
# Wrapper: parameter / layout plumbing in plain JAX, then one pallas_call
# ---------------------------------------------------------------------------
def simple_cnn_forward(x, params, *, nchans, ntimes):
    """x: (B, 1, nchans, ntimes) float32, matching the PyTorch NCHW input."""
    B = x.shape[0]
    H = nchans
    T = ntimes - TIME_WIN + 1
    x2 = x[:, 0, :, :]                                         # (B, H, ntimes)

    # im2col: pT[(b,t), (k,h)] = x[b, h, t+k]   (layout plumbing, tiny)
    patches = jnp.stack([x2[:, :, k:k + T] for k in range(TIME_WIN)], axis=-1)
    pT = patches.transpose(0, 2, 3, 1).reshape(B * T, TIME_WIN * H)

    # conv1 weight as block-diagonal over channel rows: cols indexed (o, g)
    w1 = params["conv1_w"].reshape(L1_OUT, TIME_WIN)           # (32, 5)
    eye = jnp.eye(H, dtype=w1.dtype)
    w1big = jnp.einsum("ko,hg->khog", w1.T, eye).reshape(TIME_WIN * H, L1_OUT * H)
    b1big = jnp.repeat(params["conv1_b"], H).reshape(1, L1_OUT * H)

    # conv2 weight with rows indexed (o, g) to match a1's column order
    w2 = params["conv2_w"][:, :, :, 0]                         # (64, 32, H)
    w2t = jnp.transpose(w2, (1, 2, 0)).reshape(L1_OUT * H, L2_OUT)
    b2 = params["conv2_b"].reshape(1, L2_OUT)

    # fc1 weight with rows permuted from torch's (c*T + t) to kernel's (t*64 + c)
    wfc1 = params["fc1_w"].reshape(FC1_OUT, L2_OUT, T)         # (f, c, t)
    wfc1 = jnp.transpose(wfc1, (2, 1, 0)).reshape(T * L2_OUT, FC1_OUT)
    bfc1 = params["fc1_b"].reshape(1, FC1_OUT)
    wfc2 = params["fc2_w"].reshape(1, FC1_OUT)
    bfc2 = params["fc2_b"].reshape(1, 1)

    out = pl.pallas_call(
        functools.partial(_fused_kernel, batch=B, tprime=T),
        out_shape=jax.ShapeDtypeStruct((B, 1), jnp.float32),
        in_specs=[pl.BlockSpec(memory_space=pltpu.MemorySpace.VMEM)] * 9,
        out_specs=pl.BlockSpec(memory_space=pltpu.MemorySpace.VMEM),
        scratch_shapes=[pltpu.VMEM((B, T * L2_OUT), jnp.float32)],
    )(pT, w1big, b1big, w2t, b2, wfc1, bfc1, wfc2, bfc2)
    return out                                                 # (B, 1)


# ---------------------------------------------------------------------------
# Pure-JAX reference for correctness checking
# ---------------------------------------------------------------------------
def reference_forward(x, params, *, nchans, ntimes):
    T = ntimes - TIME_WIN + 1
    B = x.shape[0]
    xs = x[:, 0]                                               # (B, H, ntimes)
    patches = jnp.stack([xs[:, :, k:k + T] for k in range(TIME_WIN)], axis=-1)
    w1 = params["conv1_w"].reshape(L1_OUT, TIME_WIN)
    a1 = jnp.einsum("bhtk,ok->boht", patches, w1) \
        + params["conv1_b"][None, :, None, None]
    a1 = jnp.maximum(a1, 0.0)                                  # (B, 32, H, T')
    w2 = params["conv2_w"][:, :, :, 0]                         # (64, 32, H)
    a2 = jnp.einsum("boht,coh->bct", a1, w2) + params["conv2_b"][None, :, None]
    a2 = jnp.maximum(a2, 0.0)                                  # (B, 64, T')
    y = a2.reshape(B, -1)
    h1 = jnp.maximum(y @ params["fc1_w"].T + params["fc1_b"], 0.0)
    z = h1 @ params["fc2_w"].T + params["fc2_b"]
    return jax.nn.sigmoid(z)


def init_params(key, nchans, ntimes):
    tprime = ntimes - TIME_WIN + 1
    lin_in = tprime * L2_OUT                                   # conv2 spans all channels
    ks = jax.random.split(key, 8)
    scale = 0.1
    return {
        "conv1_w": scale * jax.random.normal(ks[0], (L1_OUT, 1, 1, TIME_WIN), jnp.float32),
        "conv1_b": scale * jax.random.normal(ks[1], (L1_OUT,), jnp.float32),
        "conv2_w": scale * jax.random.normal(ks[2], (L2_OUT, L1_OUT, nchans, 1), jnp.float32),
        "conv2_b": scale * jax.random.normal(ks[3], (L2_OUT,), jnp.float32),
        "fc1_w": scale * jax.random.normal(ks[4], (FC1_OUT, lin_in), jnp.float32),
        "fc1_b": scale * jax.random.normal(ks[5], (FC1_OUT,), jnp.float32),
        "fc2_w": scale * jax.random.normal(ks[6], (1, FC1_OUT), jnp.float32),
        "fc2_b": scale * jax.random.normal(ks[7], (1,), jnp.float32),
    }


if __name__ == "__main__":
    B, NCHANS, NTIMES = 2, 4, 16

    key = jax.random.PRNGKey(0)
    k_x, k_p = jax.random.split(key)
    x = jax.random.normal(k_x, (B, 1, NCHANS, NTIMES), jnp.float32)
    params = init_params(k_p, NCHANS, NTIMES)

    fwd = jax.jit(functools.partial(simple_cnn_forward, nchans=NCHANS, ntimes=NTIMES))
    out = jax.block_until_ready(fwd(x, params))

    ref = jax.block_until_ready(
        reference_forward(x, params, nchans=NCHANS, ntimes=NTIMES))

    assert out.shape == (B, 1), out.shape
    assert jnp.allclose(out, ref, atol=1e-5, rtol=1e-5), (out, ref)
    print("KERNEL_OK")
</pallas_src>

<mosaic_0001>
module attributes {stable_mosaic.version = 11 : i64} {
  func.func @_fused_kernel(%arg0: memref<24x20xf32, #tpu.memory_space<vmem>>, %arg1: memref<20x128xf32, #tpu.memory_space<vmem>>, %arg2: memref<1x128xf32, #tpu.memory_space<vmem>>, %arg3: memref<128x64xf32, #tpu.memory_space<vmem>>, %arg4: memref<1x64xf32, #tpu.memory_space<vmem>>, %arg5: memref<768x128xf32, #tpu.memory_space<vmem>>, %arg6: memref<1x128xf32, #tpu.memory_space<vmem>>, %arg7: memref<1x128xf32, #tpu.memory_space<vmem>>, %arg8: memref<1x1xf32, #tpu.memory_space<vmem>>, %arg9: memref<2x1xf32, #tpu.memory_space<vmem>>, %arg10: memref<2x768xf32, #tpu.memory_space<vmem>>) attributes {dimension_semantics = [], scalar_prefetch = 0 : i64, scratch_operands = 1 : i64, tpu.core_type = #tpu.core_type<tc>} {
    %c0 = arith.constant 0 : index
    %c0_0 = arith.constant 0 : index
    %0 = vector.load %arg0[%c0, %c0_0] : memref<24x20xf32, #tpu.memory_space<vmem>>, vector<24x20xf32>
    %c0_1 = arith.constant 0 : index
    %c0_2 = arith.constant 0 : index
    %1 = vector.load %arg1[%c0_1, %c0_2] : memref<20x128xf32, #tpu.memory_space<vmem>>, vector<20x128xf32>
    %cst = arith.constant dense<0.000000e+00> : vector<24x128xf32>
    %2 = tpu.matmul %0, %1, %cst {dimension_numbers = #tpu.dot_dimension_numbers<[1], [0], [0], [1], [0, 0, 1, 1], [], []>} : vector<24x20xf32>, vector<20x128xf32>, vector<24x128xf32> -> vector<24x128xf32>
    %c0_3 = arith.constant 0 : index
    %c0_4 = arith.constant 0 : index
    %3 = vector.load %arg2[%c0_3, %c0_4] : memref<1x128xf32, #tpu.memory_space<vmem>>, vector<1x128xf32>
    %4 = vector.broadcast %3 : vector<1x128xf32> to vector<24x128xf32>
    %5 = arith.addf %2, %4 : vector<24x128xf32>
    %cst_5 = arith.constant 0.000000e+00 : f32
    %6 = vector.broadcast %cst_5 : f32 to vector<24x128xf32>
    %7 = arith.maximumf %5, %6 : vector<24x128xf32>
    %c0_6 = arith.constant 0 : index
    %c0_7 = arith.constant 0 : index
    %8 = vector.load %arg3[%c0_6, %c0_7] : memref<128x64xf32, #tpu.memory_space<vmem>>, vector<128x64xf32>
    %cst_8 = arith.constant dense<0.000000e+00> : vector<24x64xf32>
    %9 = tpu.matmul %7, %8, %cst_8 {dimension_numbers = #tpu.dot_dimension_numbers<[1], [0], [0], [1], [0, 0, 1, 1], [], []>} : vector<24x128xf32>, vector<128x64xf32>, vector<24x64xf32> -> vector<24x64xf32>
    %c0_9 = arith.constant 0 : index
    %c0_10 = arith.constant 0 : index
    %10 = vector.load %arg4[%c0_9, %c0_10] : memref<1x64xf32, #tpu.memory_space<vmem>>, vector<1x64xf32>
    %11 = vector.broadcast %10 : vector<1x64xf32> to vector<24x64xf32>
    %12 = arith.addf %9, %11 : vector<24x64xf32>
    %cst_11 = arith.constant 0.000000e+00 : f32
    %13 = vector.broadcast %cst_11 : f32 to vector<24x64xf32>
    %14 = arith.maximumf %12, %13 : vector<24x64xf32>
    %15 = vector.extract_strided_slice %14 {offsets = [0, 0], sizes = [1, 64], strides = [1, 1]} : vector<24x64xf32> to vector<1x64xf32>
    %c0_12 = arith.constant 0 : index
    %c0_13 = arith.constant 0 : index
    %16 = vector.load %arg10[%c0_12, %c0_13] : memref<2x768xf32, #tpu.memory_space<vmem>>, vector<1x64xf32>
    tpu.vector_store %arg10[%c0_12, %c0_13], %15 {strides = array<i32>} : memref<2x768xf32, #tpu.memory_space<vmem>>, vector<1x64xf32>,
    %17 = vector.extract_strided_slice %14 {offsets = [1, 0], sizes = [1, 64], strides = [1, 1]} : vector<24x64xf32> to vector<1x64xf32>
    %c0_14 = arith.constant 0 : index
    %c64 = arith.constant 64 : index
    %18 = vector.load %arg10[%c0_14, %c64] : memref<2x768xf32, #tpu.memory_space<vmem>>, vector<1x64xf32>
    tpu.vector_store %arg10[%c0_14, %c64], %17 {strides = array<i32>} : memref<2x768xf32, #tpu.memory_space<vmem>>, vector<1x64xf32>,
    %19 = vector.extract_strided_slice %14 {offsets = [2, 0], sizes = [1, 64], strides = [1, 1]} : vector<24x64xf32> to vector<1x64xf32>
    %c0_15 = arith.constant 0 : index
    %c128 = arith.constant 128 : index
    %20 = vector.load %arg10[%c0_15, %c128] : memref<2x768xf32, #tpu.memory_space<vmem>>, vector<1x64xf32>
    tpu.vector_store %arg10[%c0_15, %c128], %19 {strides = array<i32>} : memref<2x768xf32, #tpu.memory_space<vmem>>, vector<1x64xf32>,
    %21 = vector.extract_strided_slice %14 {offsets = [3, 0], sizes = [1, 64], strides = [1, 1]} : vector<24x64xf32> to vector<1x64xf32>
    %c0_16 = arith.constant 0 : index
    %c192 = arith.constant 192 : index
    %22 = vector.load %arg10[%c0_16, %c192] : memref<2x768xf32, #tpu.memory_space<vmem>>, vector<1x64xf32>
    tpu.vector_store %arg10[%c0_16, %c192], %21 {strides = array<i32>} : memref<2x768xf32, #tpu.memory_space<vmem>>, vector<1x64xf32>,
    %23 = vector.extract_strided_slice %14 {offsets = [4, 0], sizes = [1, 64], strides = [1, 1]} : vector<24x64xf32> to vector<1x64xf32>
    %c0_17 = arith.constant 0 : index
    %c256 = arith.constant 256 : index
    %24 = vector.load %arg10[%c0_17, %c256] : memref<2x768xf32, #tpu.memory_space<vmem>>, vector<1x64xf32>
    tpu.vector_store %arg10[%c0_17, %c256], %23 {strides = array<i32>} : memref<2x768xf32, #tpu.memory_space<vmem>>, vector<1x64xf32>,
    %25 = vector.extract_strided_slice %14 {offsets = [5, 0], sizes = [1, 64], strides = [1, 1]} : vector<24x64xf32> to vector<1x64xf32>
    %c0_18 = arith.constant 0 : index
    %c320 = arith.constant 320 : index
    %26 = vector.load %arg10[%c0_18, %c320] : memref<2x768xf32, #tpu.memory_space<vmem>>, vector<1x64xf32>
    tpu.vector_store %arg10[%c0_18, %c320], %25 {strides = array<i32>} : memref<2x768xf32, #tpu.memory_space<vmem>>, vector<1x64xf32>,
    %27 = vector.extract_strided_slice %14 {offsets = [6, 0], sizes = [1, 64], strides = [1, 1]} : vector<24x64xf32> to vector<1x64xf32>
    %c0_19 = arith.constant 0 : index
    %c384 = arith.constant 384 : index
    %28 = vector.load %arg10[%c0_19, %c384] : memref<2x768xf32, #tpu.memory_space<vmem>>, vector<1x64xf32>
    tpu.vector_store %arg10[%c0_19, %c384], %27 {strides = array<i32>} : memref<2x768xf32, #tpu.memory_space<vmem>>, vector<1x64xf32>,
    %29 = vector.extract_strided_slice %14 {offsets = [7, 0], sizes = [1, 64], strides = [1, 1]} : vector<24x64xf32> to vector<1x64xf32>
    %c0_20 = arith.constant 0 : index
    %c448 = arith.constant 448 : index
    %30 = vector.load %arg10[%c0_20, %c448] : memref<2x768xf32, #tpu.memory_space<vmem>>, vector<1x64xf32>
    tpu.vector_store %arg10[%c0_20, %c448], %29 {strides = array<i32>} : memref<2x768xf32, #tpu.memory_space<vmem>>, vector<1x64xf32>,
    %31 = vector.extract_strided_slice %14 {offsets = [8, 0], sizes = [1, 64], strides = [1, 1]} : vector<24x64xf32> to vector<1x64xf32>
    %c0_21 = arith.constant 0 : index
    %c512 = arith.constant 512 : index
    %32 = vector.load %arg10[%c0_21, %c512] : memref<2x768xf32, #tpu.memory_space<vmem>>, vector<1x64xf32>
    tpu.vector_store %arg10[%c0_21, %c512], %31 {strides = array<i32>} : memref<2x768xf32, #tpu.memory_space<vmem>>, vector<1x64xf32>,
    %33 = vector.extract_strided_slice %14 {offsets = [9, 0], sizes = [1, 64], strides = [1, 1]} : vector<24x64xf32> to vector<1x64xf32>
    %c0_22 = arith.constant 0 : index
    %c576 = arith.constant 576 : index
    %34 = vector.load %arg10[%c0_22, %c576] : memref<2x768xf32, #tpu.memory_space<vmem>>, vector<1x64xf32>
    tpu.vector_store %arg10[%c0_22, %c576], %33 {strides = array<i32>} : memref<2x768xf32, #tpu.memory_space<vmem>>, vector<1x64xf32>,
    %35 = vector.extract_strided_slice %14 {offsets = [10, 0], sizes = [1, 64], strides = [1, 1]} : vector<24x64xf32> to vector<1x64xf32>
    %c0_23 = arith.constant 0 : index
    %c640 = arith.constant 640 : index
    %36 = vector.load %arg10[%c0_23, %c640] : memref<2x768xf32, #tpu.memory_space<vmem>>, vector<1x64xf32>
    tpu.vector_store %arg10[%c0_23, %c640], %35 {strides = array<i32>} : memref<2x768xf32, #tpu.memory_space<vmem>>, vector<1x64xf32>,
    %37 = vector.extract_strided_slice %14 {offsets = [11, 0], sizes = [1, 64], strides = [1, 1]} : vector<24x64xf32> to vector<1x64xf32>
    %c0_24 = arith.constant 0 : index
    %c704 = arith.constant 704 : index
    %38 = vector.load %arg10[%c0_24, %c704] : memref<2x768xf32, #tpu.memory_space<vmem>>, vector<1x64xf32>
    tpu.vector_store %arg10[%c0_24, %c704], %37 {strides = array<i32>} : memref<2x768xf32, #tpu.memory_space<vmem>>, vector<1x64xf32>,
    %39 = vector.extract_strided_slice %14 {offsets = [12, 0], sizes = [1, 64], strides = [1, 1]} : vector<24x64xf32> to vector<1x64xf32>
    %c1 = arith.constant 1 : index
    %c0_25 = arith.constant 0 : index
    %40 = vector.load %arg10[%c1, %c0_25] : memref<2x768xf32, #tpu.memory_space<vmem>>, vector<1x64xf32>
    tpu.vector_store %arg10[%c1, %c0_25], %39 {strides = array<i32>} : memref<2x768xf32, #tpu.memory_space<vmem>>, vector<1x64xf32>,
    %41 = vector.extract_strided_slice %14 {offsets = [13, 0], sizes = [1, 64], strides = [1, 1]} : vector<24x64xf32> to vector<1x64xf32>
    %c1_26 = arith.constant 1 : index
    %c64_27 = arith.constant 64 : index
    %42 = vector.load %arg10[%c1_26, %c64_27] : memref<2x768xf32, #tpu.memory_space<vmem>>, vector<1x64xf32>
    tpu.vector_store %arg10[%c1_26, %c64_27], %41 {strides = array<i32>} : memref<2x768xf32, #tpu.memory_space<vmem>>, vector<1x64xf32>,
    %43 = vector.extract_strided_slice %14 {offsets = [14, 0], sizes = [1, 64], strides = [1, 1]} : vector<24x64xf32> to vector<1x64xf32>
    %c1_28 = arith.constant 1 : index
    %c128_29 = arith.constant 128 : index
    %44 = vector.load %arg10[%c1_28, %c128_29] : memref<2x768xf32, #tpu.memory_space<vmem>>, vector<1x64xf32>
    tpu.vector_store %arg10[%c1_28, %c128_29], %43 {strides = array<i32>} : memref<2x768xf32, #tpu.memory_space<vmem>>, vector<1x64xf32>,
    %45 = vector.extract_strided_slice %14 {offsets = [15, 0], sizes = [1, 64], strides = [1, 1]} : vector<24x64xf32> to vector<1x64xf32>
    %c1_30 = arith.constant 1 : index
    %c192_31 = arith.constant 192 : index
    %46 = vector.load %arg10[%c1_30, %c192_31] : memref<2x768xf32, #tpu.memory_space<vmem>>, vector<1x64xf32>
    tpu.vector_store %arg10[%c1_30, %c192_31], %45 {strides = array<i32>} : memref<2x768xf32, #tpu.memory_space<vmem>>, vector<1x64xf32>,
    %47 = vector.extract_strided_slice %14 {offsets = [16, 0], sizes = [1, 64], strides = [1, 1]} : vector<24x64xf32> to vector<1x64xf32>
    %c1_32 = arith.constant 1 : index
    %c256_33 = arith.constant 256 : index
    %48 = vector.load %arg10[%c1_32, %c256_33] : memref<2x768xf32, #tpu.memory_space<vmem>>, vector<1x64xf32>
    tpu.vector_store %arg10[%c1_32, %c256_33], %47 {strides = array<i32>} : memref<2x768xf32, #tpu.memory_space<vmem>>, vector<1x64xf32>,
    %49 = vector.extract_strided_slice %14 {offsets = [17, 0], sizes = [1, 64], strides = [1, 1]} : vector<24x64xf32> to vector<1x64xf32>
    %c1_34 = arith.constant 1 : index
    %c320_35 = arith.constant 320 : index
    %50 = vector.load %arg10[%c1_34, %c320_35] : memref<2x768xf32, #tpu.memory_space<vmem>>, vector<1x64xf32>
    tpu.vector_store %arg10[%c1_34, %c320_35], %49 {strides = array<i32>} : memref<2x768xf32, #tpu.memory_space<vmem>>, vector<1x64xf32>,
    %51 = vector.extract_strided_slice %14 {offsets = [18, 0], sizes = [1, 64], strides = [1, 1]} : vector<24x64xf32> to vector<1x64xf32>
    %c1_36 = arith.constant 1 : index
    %c384_37 = arith.constant 384 : index
    %52 = vector.load %arg10[%c1_36, %c384_37] : memref<2x768xf32, #tpu.memory_space<vmem>>, vector<1x64xf32>
    tpu.vector_store %arg10[%c1_36, %c384_37], %51 {strides = array<i32>} : memref<2x768xf32, #tpu.memory_space<vmem>>, vector<1x64xf32>,
    %53 = vector.extract_strided_slice %14 {offsets = [19, 0], sizes = [1, 64], strides = [1, 1]} : vector<24x64xf32> to vector<1x64xf32>
    %c1_38 = arith.constant 1 : index
    %c448_39 = arith.constant 448 : index
    %54 = vector.load %arg10[%c1_38, %c448_39] : memref<2x768xf32, #tpu.memory_space<vmem>>, vector<1x64xf32>
    tpu.vector_store %arg10[%c1_38, %c448_39], %53 {strides = array<i32>} : memref<2x768xf32, #tpu.memory_space<vmem>>, vector<1x64xf32>,
    %55 = vector.extract_strided_slice %14 {offsets = [20, 0], sizes = [1, 64], strides = [1, 1]} : vector<24x64xf32> to vector<1x64xf32>
    %c1_40 = arith.constant 1 : index
    %c512_41 = arith.constant 512 : index
    %56 = vector.load %arg10[%c1_40, %c512_41] : memref<2x768xf32, #tpu.memory_space<vmem>>, vector<1x64xf32>
    tpu.vector_store %arg10[%c1_40, %c512_41], %55 {strides = array<i32>} : memref<2x768xf32, #tpu.memory_space<vmem>>, vector<1x64xf32>,
    %57 = vector.extract_strided_slice %14 {offsets = [21, 0], sizes = [1, 64], strides = [1, 1]} : vector<24x64xf32> to vector<1x64xf32>
    %c1_42 = arith.constant 1 : index
    %c576_43 = arith.constant 576 : index
    %58 = vector.load %arg10[%c1_42, %c576_43] : memref<2x768xf32, #tpu.memory_space<vmem>>, vector<1x64xf32>
    tpu.vector_store %arg10[%c1_42, %c576_43], %57 {strides = array<i32>} : memref<2x768xf32, #tpu.memory_space<vmem>>, vector<1x64xf32>,
    %59 = vector.extract_strided_slice %14 {offsets = [22, 0], sizes = [1, 64], strides = [1, 1]} : vector<24x64xf32> to vector<1x64xf32>
    %c1_44 = arith.constant 1 : index
    %c640_45 = arith.constant 640 : index
    %60 = vector.load %arg10[%c1_44, %c640_45] : memref<2x768xf32, #tpu.memory_space<vmem>>, vector<1x64xf32>
    tpu.vector_store %arg10[%c1_44, %c640_45], %59 {strides = array<i32>} : memref<2x768xf32, #tpu.memory_space<vmem>>, vector<1x64xf32>,
    %61 = vector.extract_strided_slice %14 {offsets = [23, 0], sizes = [1, 64], strides = [1, 1]} : vector<24x64xf32> to vector<1x64xf32>
    %c1_46 = arith.constant 1 : index
    %c704_47 = arith.constant 704 : index
    %62 = vector.load %arg10[%c1_46, %c704_47] : memref<2x768xf32, #tpu.memory_space<vmem>>, vector<1x64xf32>
    tpu.vector_store %arg10[%c1_46, %c704_47], %61 {strides = array<i32>} : memref<2x768xf32, #tpu.memory_space<vmem>>, vector<1x64xf32>,
    %c0_48 = arith.constant 0 : index
    %c0_49 = arith.constant 0 : index
    %63 = vector.load %arg10[%c0_48, %c0_49] : memref<2x768xf32, #tpu.memory_space<vmem>>, vector<2x768xf32>
    %c0_50 = arith.constant 0 : index
    %c0_51 = arith.constant 0 : index
    %64 = vector.load %arg5[%c0_50, %c0_51] : memref<768x128xf32, #tpu.memory_space<vmem>>, vector<768x128xf32>
    %cst_52 = arith.constant dense<0.000000e+00> : vector<2x128xf32>
    %65 = tpu.matmul %63, %64, %cst_52 {dimension_numbers = #tpu.dot_dimension_numbers<[1], [0], [0], [1], [0, 0, 1, 1], [], []>} : vector<2x768xf32>, vector<768x128xf32>, vector<2x128xf32> -> vector<2x128xf32>
    %c0_53 = arith.constant 0 : index
    %c0_54 = arith.constant 0 : index
    %66 = vector.load %arg6[%c0_53, %c0_54] : memref<1x128xf32, #tpu.memory_space<vmem>>, vector<1x128xf32>
    %67 = vector.broadcast %66 : vector<1x128xf32> to vector<2x128xf32>
    %68 = arith.addf %65, %67 : vector<2x128xf32>
    %cst_55 = arith.constant 0.000000e+00 : f32
    %69 = vector.broadcast %cst_55 : f32 to vector<2x128xf32>
    %70 = arith.maximumf %68, %69 : vector<2x128xf32>
    %c0_56 = arith.constant 0 : index
    %c0_57 = arith.constant 0 : index
    %71 = vector.load %arg7[%c0_56, %c0_57] : memref<1x128xf32, #tpu.memory_space<vmem>>, vector<1x128xf32>
    %72 = vector.broadcast %71 : vector<1x128xf32> to vector<2x128xf32>
    %73 = arith.mulf %70, %72 : vector<2x128xf32>
    %cst_58 = arith.constant dense<0.000000e+00> : vector<2xf32>
    %74 = vector.multi_reduction <add>, %73, %cst_58 [1] : vector<2x128xf32> to vector<2xf32>
    %75 = vector.shape_cast %74 : vector<2xf32> to vector<2x1xf32>
    %c0_59 = arith.constant 0 : index
    %c0_60 = arith.constant 0 : index
    %76 = vector.load %arg8[%c0_59, %c0_60] : memref<1x1xf32, #tpu.memory_space<vmem>>, vector<1x1xf32>
    %77 = vector.broadcast %76 : vector<1x1xf32> to vector<2x1xf32>
    %78 = arith.addf %75, %77 : vector<2x1xf32>
    %79 = arith.negf %78 : vector<2x1xf32>
    %80 = math.exp %79 : vector<2x1xf32>
    %cst_61 = arith.constant 1.000000e+00 : f32
    %81 = vector.broadcast %cst_61 : f32 to vector<2x1xf32>
    %82 = arith.addf %81, %80 : vector<2x1xf32>
    %83 = arith.divf %81, %82 : vector<2x1xf32>
    %c0_62 = arith.constant 0 : index
    %c0_63 = arith.constant 0 : index
    %84 = vector.load %arg9[%c0_62, %c0_63] : memref<2x1xf32, #tpu.memory_space<vmem>>, vector<2x1xf32>
    tpu.vector_store %arg9[%c0_62, %c0_63], %83 {strides = array<i32>} : memref<2x1xf32, #tpu.memory_space<vmem>>, vector<2x1xf32>,
    return
  }
}

</mosaic_0001>

<bundles_post_ra>
// kernel: simple_cnn_forward.1
= control target key start
LH: loop header
LB: loop body
LE: loop exit
PB: predicated region body
PF: predicated region fallthrough
CT: control target
= control target key end

     0   :  { %vm57_vm0 = vcmask 1043456   ;;  %v998_v0 = vmov 0.0   ;;  %vm999_vm1 = vmmov 0   ;;  %vm47_vm2 = vcmask 162816   ;;  %s1001_s28 = smov 64   ;;  %s1518_s1 = inlined_call_operand.vmem [shape: f32[20,128], index: 1, kind: input, shape index: {}]   ;;  %s1519_s3 = inlined_call_operand.vmem [shape: f32[128,64], index: 3, kind: input, shape index: {}]   ;;  %s1520_s0 = inlined_call_operand.vmem [shape: f32[24,20], index: 0, kind: input, shape index: {}]   ;;  %s1521_s2 = inlined_call_operand.vmem [shape: f32[1,128], index: 2, kind: input, shape index: {}]   ;;  %s1522_s5 = inlined_call_operand.vmem [shape: f32[768,128], index: 5, kind: input, shape index: {}]   ;;  %s1523_s4 = inlined_call_operand.vmem [shape: f32[1,64], index: 4, kind: input, shape index: {}]   ;;  %s1524_s8 = inlined_call_operand.<no memory space> [shape: f32[1,1], index: 8, kind: input, shape index: {}]   ;;  %s1525_s6 = inlined_call_operand.vmem [shape: f32[1,128], index: 6, kind: input, shape index: {}]   ;;  %s1526_s7 = inlined_call_operand.vmem [shape: f32[1,128], index: 7, kind: input, shape index: {}]   ;;  %s1527_s9 = inlined_call_operand.vmem [shape: f32[2,1], index: 9, kind: output, shape index: {}]  }
   0x1   :  { %933 = vmatprep.subr.mxu0 %v998_v0  ;;  %v39_v1 = vld [vmem:[%s1518_s1 + $0x10] sm:$0xf]  ;;  %v38_v2 = vld [vmem:[%s1518_s1 + $0x8] sm:$0xff]  ;;  %939 = vmatprep.mubr.msk.f32.mxu0 %vm999_vm1, %v998_v0  ;;  %v37_v3 = vld [vmem:[%s1518_s1] sm:$0xff]  ;;  %v1000_v45 = vmov 1983009808   ;;  %v256_v47 = vlaneseq }
   0x2   :  { %934 = vmatpush3.msk.msra.mxu0 %vm57_vm0, %v39_v1  ;;  %948 = vmatprep.subr.mxu1 %v998_v0  ;;  %v159_v4 = vld [vmem:[%s1519_s3 + $0x78] sm:$0xff]  ;;  %v158_v5 = vld [vmem:[%s1519_s3 + $0x70] sm:$0xff]  ;;  %v34_v6 = vld [vmem:[%s1520_s0] sm:$0xff]  ;;  %v254_v46 = vunpack.c.l.s4 %v1000_v45  ;;  %vm250_vm3 = vcmask 516096   ;;  %vm265_vm4 = vcmask 1040896   ;;  %vm756_vm5 = vcmask 1041408  }
   0x3   :  { %935 = vmatprep.subr.mxu0 %v998_v0  ;;  %980 = vmatprep.mubr.msk.f32.mxu1 %vm999_vm1, %v998_v0  ;;  %v157_v7 = vld [vmem:[%s1519_s3 + $0x68] sm:$0xff]  ;;  %v156_v8 = vld [vmem:[%s1519_s3 + $0x60] sm:$0xff]  ;;  %v155_v10 = vld [vmem:[%s1519_s3 + $0x58] sm:$0xff]  ;;  %v257_v53 = vshrl.u32 %v256_v47, 7  ;;  %vm774_vm6 = vcmask 1024  }
   0x4   :  { %936 = vmatpush3.msra.mxu0 %v38_v2  ;;  %949 = vmatpush3.msra.mxu1 %v159_v4  ;;  %v35_v9 = vld [vmem:[%s1520_s0 + $0x8] sm:$0xff]  ;;  %v154_v11 = vld [vmem:[%s1519_s3 + $0x50] sm:$0xff]  ;;  %v152_v14 = vld [vmem:[%s1519_s3 + $0x40] sm:$0xff]  ;;  %v255_v52 = vunpack.c.0.s8 %v254_v46 }
   0x5   :  { %937 = vmatprep.subr.mxu0 %v998_v0  ;;  %950 = vmatprep.subr.mxu1 %v998_v0  ;;  %v36_v12 = vld [vmem:[%s1520_s0 + $0x10] sm:$0xff]  ;;  %v153_v13 = vld [vmem:[%s1519_s3 + $0x48] sm:$0xff]  ;;  %v151_v15 = vld [vmem:[%s1519_s3 + $0x38] sm:$0xff] }
   0x6   :  { %938 = vmatpush3.msra.mxu0 %v37_v3  ;;  %951 = vmatpush3.msra.mxu1 %v158_v5  ;;  %v150_v16 = vld [vmem:[%s1519_s3 + $0x30] sm:$0xff]  ;;  %v149_v17 = vld [vmem:[%s1519_s3 + $0x28] sm:$0xff]  ;;  %v148_v18 = vld [vmem:[%s1519_s3 + $0x20] sm:$0xff] }
   0x7   :  { %940 = vmatmul.mubr.msk.f32.vlgmr.msra.gmra.mxu0 %vm47_vm2, %v34_v6  ;;  %952 = vmatprep.subr.mxu1 %v998_v0  ;;  %v147_v19 = vld [vmem:[%s1519_s3 + $0x18] sm:$0xff]  ;;  %v146_v20 = vld [vmem:[%s1519_s3 + $0x10] sm:$0xff]  ;;  %v145_v21 = vld [vmem:[%s1519_s3 + $0x8] sm:$0xff] }
   0x8   :  { %942 = vmatprep.mubr.msk.f32.mxu0 %vm999_vm1, %v998_v0  ;;  %953 = vmatpush3.msra.mxu1 %v157_v7  ;;  %v144_v22 = vld [vmem:[%s1519_s3] sm:$0xff]  ;;  %v432_v36 = vld [vmem:[%s1522_s5 + $0xf8] sm:$0xff]  ;;  %v431_v38 = vld [vmem:[%s1522_s5 + $0xf0] sm:$0xff] }
   0x9   :  { %954 = vmatprep.subr.mxu1 %v998_v0  ;;  %v780_v23 = vld [vmem:[%s1521_s2] ss:$0 sm:$0xff]  ;;  %v416_v37 = vld [vmem:[%s1522_s5 + $0x78] sm:$0xff]  ;;  %828 = vmatprep.subr.mxu0 %v432_v36  ;;  %v415_v39 = vld [vmem:[%s1522_s5 + $0x70] sm:$0xff] }
   0xa   :  { %955 = vmatpush3.msra.mxu1 %v156_v8  ;;  %v464_v40 = vld [vmem:[%s1522_s5 + $0x1f8] sm:$0xff]  ;;  %829 = vmatpush3.msra.mxu0 %v416_v37  ;;  %v430_v41 = vld [vmem:[%s1522_s5 + $0xe8] sm:$0xff]  ;;  %v463_v43 = vld [vmem:[%s1522_s5 + $0x1f0] sm:$0xff] }
   0xb   :  { %943 = vmatmul.mubr.msk.f32.gmra.mxu0 %vm47_vm2, %v35_v9  ;;  %956 = vmatprep.subr.mxu1 %v998_v0  ;;  %v448_v42 = vld [vmem:[%s1522_s5 + $0x178] sm:$0xff]  ;;  %v414_v44 = vld [vmem:[%s1522_s5 + $0x68] sm:$0xff]  ;;  %v429_v48 = vld [vmem:[%s1522_s5 + $0xe0] sm:$0xff] }
   0xc   :  { %945 = vmatprep.mubr.msk.f32.mxu0 %vm999_vm1, %v998_v0  ;;  %957 = vmatpush3.msra.mxu1 %v155_v10  ;;  %v447_v49 = vld [vmem:[%s1522_s5 + $0x170] sm:$0xff]  ;;  %v413_v50 = vld [vmem:[%s1522_s5 + $0x60] sm:$0xff]  ;;  %v462_v54 = vld [vmem:[%s1522_s5 + $0x1e8] sm:$0xff] }
   0xd   :  { %958 = vmatprep.subr.mxu1 %v998_v0  ;;  %830 = vmatprep.subr.mxu0 %v431_v38  ;;  %v1194_v51 = vld [vmem:[%s1523_s4] ss:$0 sm:$0xff]  ;;  %v428_v55 = vld [vmem:[%s1522_s5 + $0xd8] sm:$0xff]  ;;  %v446_v56 = vld [vmem:[%s1522_s5 + $0x168] sm:$0xff] }
   0xe   :  { %959 = vmatpush3.msra.mxu1 %v154_v11  ;;  %831 = vmatpush3.msra.mxu0 %v415_v39  ;;  %v412_v57 = vld [vmem:[%s1522_s5 + $0x58] sm:$0xff]  ;;  %v461_v58 = vld [vmem:[%s1522_s5 + $0x1e0] sm:$0xff]  ;;  %v427_v60 = vld [vmem:[%s1522_s5 + $0xd0] sm:$0xff] }
   0xf   :  { %946 = vmatmul.mubr.msk.f32.gmra.mxu0 %vm47_vm2, %v36_v12  ;;  %960 = vmatprep.subr.mxu1 %v998_v0  ;;  %v445_v61 = vld [vmem:[%s1522_s5 + $0x160] sm:$0xff]  ;;  %v411_v62 = vld [vmem:[%s1522_s5 + $0x50] sm:$0xff]  ;;  %v460_v1 = vld [vmem:[%s1522_s5 + $0x1d8] sm:$0xff] }
  0x10   :  { %961 = vmatpush3.msra.mxu1 %v153_v13  ;;  %832 = vmatprep.subr.mxu0 %v430_v41  ;;  %v426_v3 = vld [vmem:[%s1522_s5 + $0xc8] sm:$0xff]  ;;  %v444_v4 = vld [vmem:[%s1522_s5 + $0x158] sm:$0xff]  ;;  %v459_v7 = vld [vmem:[%s1522_s5 + $0x1d0] sm:$0xff] }
  0x11   :  { %962 = vmatprep.subr.mxu1 %v998_v0  ;;  %833 = vmatpush3.msra.mxu0 %v414_v44  ;;  %v410_v5 = vld [vmem:[%s1522_s5 + $0x48] sm:$0xff]  ;;  %v425_v9 = vld [vmem:[%s1522_s5 + $0xc0] sm:$0xff]  ;;  %v443_v10 = vld [vmem:[%s1522_s5 + $0x150] sm:$0xff] }
  0x12   :  { %963 = vmatpush3.msra.mxu1 %v152_v14  ;;  %834 = vmatprep.subr.mxu0 %v429_v48  ;;  %v409_v11 = vld [vmem:[%s1522_s5 + $0x40] sm:$0xff]  ;;  %v422_v36 = vld [vmem:[%s1522_s5 + $0xa8] sm:$0xff]  ;;  %v440_v37 = vld [vmem:[%s1522_s5 + $0x138] sm:$0xff] }
  0x13   :  { %964 = vmatprep.subr.mxu1 %v998_v0  ;;  %835 = vmatpush3.msra.mxu0 %v413_v50  ;;  %v406_v38 = vld [vmem:[%s1522_s5 + $0x28] sm:$0xff]  ;;  %v421_v45 = vld [vmem:[%s1522_s5 + $0xa0] sm:$0xff]  ;;  %v439_v46 = vld [vmem:[%s1522_s5 + $0x130] sm:$0xff] }
  0x14   :  { %965 = vmatpush3.msra.mxu1 %v151_v15  ;;  %836 = vmatprep.subr.mxu0 %v428_v55  ;;  %v458_v15 = vld [vmem:[%s1522_s5 + $0x1c8] sm:$0xff] }
  0x15   :  { %966 = vmatprep.subr.mxu1 %v998_v0  ;;  %837 = vmatpush3.msra.mxu0 %v412_v57  ;;  %v438_v57 = vld [vmem:[%s1522_s5 + $0x128] sm:$0xff] }
  0x16   :  { %967 = vmatpush3.msra.mxu1 %v150_v16  ;;  %838 = vmatprep.subr.mxu0 %v427_v60 }
  0x17   :  { %968 = vmatprep.subr.mxu1 %v998_v0  ;;  %839 = vmatpush3.msra.mxu0 %v411_v62  ;;  %v419_v62 = vld [vmem:[%s1522_s5 + $0x90] sm:$0xff] }
  0x18   :  { %969 = vmatpush3.msra.mxu1 %v149_v17  ;;  %840 = vmatprep.subr.mxu0 %v426_v3  ;;  %v424_v17 = vld [vmem:[%s1522_s5 + $0xb8] sm:$0xff] }
  0x19   :  { %970 = vmatprep.subr.mxu1 %v998_v0  ;;  %841 = vmatpush3.msra.mxu0 %v410_v5  ;;  %v452_v3 = vld [vmem:[%s1522_s5 + $0x198] sm:$0xff] }
  0x1a   :  { %971 = vmatpush3.msra.mxu1 %v148_v18  ;;  %842 = vmatprep.subr.mxu0 %v425_v9  ;;  %v442_v18 = vld [vmem:[%s1522_s5 + $0x148] sm:$0xff]  ;;  %v436_v5 = vld [vmem:[%s1522_s5 + $0x118] sm:$0xff] }
  0x1b   :  { %972 = vmatprep.subr.mxu1 %v998_v0  ;;  %843 = vmatpush3.msra.mxu0 %v409_v11  ;;  %v401_v11 = vld [vmem:[%s1522_s5] sm:$0xff] }
  0x1c   :  { %973 = vmatpush3.msra.mxu1 %v147_v19  ;;  %v408_v19 = vld [vmem:[%s1522_s5 + $0x38] sm:$0xff]  ;;  %844 = vmatprep.subr.mxu0 %v424_v17 }
  0x1d   :  { %974 = vmatprep.subr.mxu1 %v998_v0  ;;  %845 = vmatpush3.msra.mxu0 %v408_v19 }
  0x1e   :  { %975 = vmatpush3.msra.mxu1 %v146_v20 }
  0x1f   :  { %976 = vmatprep.subr.mxu1 %v998_v0 }
  0x20   :  { %977 = vmatpush3.msra.mxu1 %v145_v21 }
  0x21   :  { %978 = vmatprep.subr.mxu1 %v998_v0 }
  0x22   :  { %979 = vmatpush3.msra.mxu1 %v144_v22 }
  0x23   :  { %863 = vmatprep.subr.mxu1 %v464_v40 }
  0xc7   :  { %v127_v24 = vpop.f32.mrf.mxu0 }
  0xc8   :  { %v128_v25 = vadd.f32 %v780_v23, %v127_v24  ;;  %v457_v24 = vld [vmem:[%s1522_s5 + $0x1c0] sm:$0xff] }
  0xc9   :  { %v941_v26 = vpop.f32.mrf.mxu0 }
  0xca   :  { %v141_v27 = vmax.f32 %v128_v25, 0.0  ;;  %v423_v26 = vld [vmem:[%s1522_s5 + $0xb0] sm:$0xff] }
  0xcb   :  { %v132_v28 = vpop.f32.mrf.mxu0  ;;  %846 = vmatprep.subr.mxu0 %v423_v26 }
  0xcc   :  { %v133_v29 = vadd.f32 %v780_v23, %v132_v28  ;;  %981 = vmatmul.mubr.f32.vlgmr.msra.gmra.mxu1 %v141_v27  ;;  %v441_v27 = vld [vmem:[%s1522_s5 + $0x140] sm:$0xff]  ;;  %v407_v28 = vld [vmem:[%s1522_s5 + $0x30] sm:$0xff] }
  0xcd   :  { %v944_v30 = vpop.f32.mrf.mxu0  ;;  %983 = vmatprep.mubr.msk.f32.mxu1 %vm999_vm1, %v998_v0  ;;  %864 = vmatpush3.msra.mxu1 %v448_v42 }
  0xce   :  { %v142_v31 = vmax.f32 %v133_v29, 0.0  ;;  %865 = vmatprep.subr.mxu1 %v463_v43  ;;  %847 = vmatpush3.msra.mxu0 %v407_v28  ;;  %v455_v43 = vld [vmem:[%s1522_s5 + $0x1b0] sm:$0xff] }
  0xcf   :  { %v137_v32 = vpop.f32.mrf.mxu0  ;;  %866 = vmatpush3.msra.mxu1 %v447_v49  ;;  %848 = vmatprep.subr.mxu0 %v422_v36 }
  0xd0   :  { %984 = vmatmul.mubr.f32.gmra.mxu1 %v142_v31  ;;  %v138_v33 = vadd.f32 %v780_v23, %v137_v32  ;;  %867 = vmatprep.subr.mxu1 %v462_v54 }
  0xd1   :  { %v947_v34 = vpop.f32.mrf.mxu0  ;;  %986 = vmatprep.mubr.msk.f32.mxu1 %vm999_vm1, %v998_v0  ;;  %868 = vmatpush3.msra.mxu1 %v446_v56  ;;  %v1221_v0 = vsub.s32 %v255_v52, %v257_v53  ;;  %v454_v52 = vld [vmem:[%s1522_s5 + $0x1a8] sm:$0xff]  ;;  %v420_v53 = vld [vmem:[%s1522_s5 + $0x98] sm:$0xff] }
  0xd2   :  { %v143_v35 = vmax.f32 %v138_v33, 0.0  ;;  %869 = vmatprep.subr.mxu1 %v461_v58  ;;  %v456_v33 = vld [vmem:[%s1522_s5 + $0x1b8] sm:$0xff]  ;;  %849 = vmatpush3.msra.mxu0 %v406_v38 }
  0xd3   :  { %870 = vmatpush3.msra.mxu1 %v445_v61  ;;  %850 = vmatprep.subr.mxu0 %v421_v45  ;;  %v404_v58 = vld [vmem:[%s1522_s5 + $0x18] sm:$0xff]  ;;  %v477_v45 = vld [vmem:[%s1522_s5 + $0x260] sm:$0xff] }
  0xd4   :  { %987 = vmatmul.mubr.f32.gmra.mxu1 %v143_v35  ;;  %871 = vmatprep.subr.mxu1 %v460_v1  ;;  %v403_v1 = vld [vmem:[%s1522_s5 + $0x10] sm:$0xff] }
  0xd5   :  { %872 = vmatpush3.msra.mxu1 %v444_v4  ;;  %v418_v4 = vld [vmem:[%s1522_s5 + $0x88] sm:$0xff] }
  0xd6   :  { %873 = vmatprep.subr.mxu1 %v459_v7  ;;  %v451_v7 = vld [vmem:[%s1522_s5 + $0x190] sm:$0xff] }
  0xd7   :  { %874 = vmatpush3.msra.mxu1 %v443_v10  ;;  %v435_v10 = vld [vmem:[%s1522_s5 + $0x110] sm:$0xff] }
  0xd8   :  { %875 = vmatprep.subr.mxu1 %v458_v15  ;;  %v496_v15 = vld [vmem:[%s1522_s5 + $0x2f8] sm:$0xff] }
  0xd9   :  { %876 = vmatpush3.msra.mxu1 %v442_v18  ;;  %v433_v18 = vld [vmem:[%s1522_s5 + $0x100] sm:$0xff] }
  0xda   :  { %877 = vmatprep.subr.mxu1 %v457_v24 }
  0xdb   :  { %878 = vmatpush3.msra.mxu1 %v441_v27 }
  0xdc   :  { %879 = vmatprep.subr.mxu1 %v456_v33 }
  0xdd   :  { %880 = vmatpush3.msra.mxu1 %v440_v37  ;;  %v480_v37 = vld [vmem:[%s1522_s5 + $0x278] sm:$0xff] }
  0xde   :  { %881 = vmatprep.subr.mxu1 %v455_v43  ;;  %v493_v43 = vld [vmem:[%s1522_s5 + $0x2e0] sm:$0xff] }
  0xdf   :  { %882 = vmatpush3.msra.mxu1 %v439_v46  ;;  %v492_v46 = vld [vmem:[%s1522_s5 + $0x2d8] sm:$0xff] }
  0xe0   :  { %883 = vmatprep.subr.mxu1 %v454_v52  ;;  %v489_v52 = vld [vmem:[%s1522_s5 + $0x2c0] sm:$0xff] }
  0xe1   :  { %884 = vmatpush3.msra.mxu1 %v438_v57  ;;  %v471_v57 = vld [vmem:[%s1522_s5 + $0x230] sm:$0xff] }
 0x18c   :  { %v233_v59 = vpop.f32.mrf.mxu1 }
 0x18d   :  { %v234_v63 = vadd.f32 %v1194_v51, %v233_v59  ;;  %v453_v59 = vld [vmem:[%s1522_s5 + $0x1a0] sm:$0xff] }
 0x18e   :  { %v982_v2 = vpop.f32.mrf.mxu1  ;;  %885 = vmatprep.subr.mxu1 %v453_v59  ;;  %v470_v59 = vld [vmem:[%s1522_s5 + $0x228] sm:$0xff] }
 0x18f   :  { %v247_v6 = vmax.f32 %v234_v63, 0.0  ;;  %v437_v63 = vld [vmem:[%s1522_s5 + $0x120] sm:$0xff] }
 0x190   :  { %v238_v8 = vpop.f32.mrf.mxu1  ;;  %886 = vmatpush3.msra.mxu1 %v437_v63  ;;  %v468_v63 = vld [vmem:[%s1522_s5 + $0x218] sm:$0xff] }
 0x191   :  { %v276_v12 = vcombine.high %v247_v6, %v247_v6  ;;  %v239_v13 = vadd.f32 %v1194_v51, %v238_v8  ;;  %v259_v14 = vrot.slane %v247_v6, %v1221_v0  ;;  %251 = vst.msk [vmem:[#allocation2] sm:$0x1] %vm250_vm3, %v247_v6  ;;  %v402_v6 = vld [vmem:[%s1522_s5 + $0x8] sm:$0xff]  ;;  %887 = vmatprep.subr.mxu1 %v452_v3  ;;  %v417_v8 = vld [vmem:[%s1522_s5 + $0x80] sm:$0xff] }
 0x192   :  { %v985_v16 = vpop.f32.mrf.mxu1  ;;  %888 = vmatpush3.msra.mxu1 %v436_v5  ;;  %v482_v3 = vld [vmem:[%s1522_s5 + $0x288] sm:$0xff]  ;;  %v481_v5 = vld [vmem:[%s1522_s5 + $0x280] sm:$0xff] }
 0x193   :  { %v248_v20 = vmax.f32 %v239_v13, 0.0  ;;  %v786_v21 = vrot.slane %v259_v14, 9  ;;  %v267_v22 = vcombine.high %v259_v14, %v259_v14  ;;  %v283_v23 = vrot.slane %v276_v12, %v1221_v0  ;;  %889 = vmatprep.subr.mxu1 %v451_v7  ;;  %v450_v12 = vld [vmem:[%s1522_s5 + $0x188] sm:$0xff]  ;;  %v449_v16 = vld [vmem:[%s1522_s5 + $0x180] sm:$0xff] }
 0x194   :  { %v243_v25 = vpop.f32.mrf.mxu1  ;;  %v434_v14 = vld [vmem:[%s1522_s5 + $0x108] sm:$0xff]  ;;  %890 = vmatpush3.msra.mxu1 %v435_v10  ;;  %v14_v7 = vstv %s1524_s8 }
 0x195   :  { %v1276_v29 = vrot.slane %v248_v20, %v1221_v0  ;;  %v325_v30 = vcombine.high %v248_v20, %v248_v20  ;;  %262 = vrot.lane.b32.xlu0 %v786_v21, %s1001_s28  ;;  %v244_v31 = vadd.f32 %v1194_v51, %v243_v25  ;;  %v788_v32 = vrot.slane %v283_v23, 9  ;;  %269 = vst.msk [vmem:[#allocation2 + $0x2] sm:$0x1] %vm250_vm3, %v267_v22  ;;  %v405_v51 = vld [vmem:[%s1522_s5 + $0x20] sm:$0xff] }
 0x196   :  { %285 = vst.msk [vmem:[#allocation2 + $0x4] sm:$0x1] %vm250_vm3, %v283_v23  ;;  %301 = vst.msk [vmem:[#allocation2 + $0x8] sm:$0x1] %vm250_vm3, %v248_v20  ;;  %v988_v34 = vpop.f32.mrf.mxu1  ;;  %v292_v35 = vcombine.high %v283_v23, %v283_v23  ;;  %v787_v41 = vrot.slane %v267_v22, 9  ;;  %851 = vmatpush3.msra.mxu0 %v405_v51  ;;  %891 = vmatprep.subr.mxu1 %v450_v12  ;;  %v474_v51 = vld [vmem:[%s1522_s5 + $0x248] sm:$0xff] }
 0x197   :  { %v332_v39 = vrot.slane %v325_v30, %v1221_v0  ;;  %v249_v40 = vmax.f32 %v244_v31, 0.0  ;;  %288 = vrot.lane.b32.xlu1 %v788_v32, %s1001_s28  ;;  %v1299_v42 = vcombine.high %v1276_v29, %v1276_v29  ;;  %852 = vmatprep.subr.mxu0 %v420_v53  ;;  %v790_v9 = vrot.slane %v1276_v29, 9  ;;  %v473_v53 = vld [vmem:[%s1522_s5 + $0x240] sm:$0xff]  ;;  %15 = vst [vmem:[#allocation3] sm:$0x1] %v14_v7 }
 0x198   :  { %v789_v44 = vrot.slane %v292_v35, 9  ;;  %294 = vst.msk [vmem:[#allocation2 + $0x6] sm:$0x1] %vm250_vm3, %v292_v35  ;;  %853 = vmatpush3.msra.mxu0 %v404_v58  ;;  %892 = vmatpush3.msra.mxu1 %v434_v14  ;;  %v486_v58 = vld [vmem:[%s1522_s5 + $0x2a8] sm:$0xff]  ;;  %v798_v12 = vld [vmem:[%s1525_s6] ss:$0 sm:$0xff] }
 0x199   :  { %v358_v47 = vrot.slane %v249_v40, %v1221_v0  ;;  %v374_v48 = vcombine.high %v249_v40, %v249_v40  ;;  %272 = vrot.lane.b32.xlu0 %v787_v41, %s1001_s28  ;;  %v792_v49 = vrot.slane %v332_v39, 9  ;;  %v341_v50 = vcombine.high %v332_v39, %v332_v39  ;;  %318 = vst.msk [vmem:[#allocation2 + $0xa] sm:$0x1] %vm250_vm3, %v1299_v42  ;;  %v478_v41 = vld [vmem:[%s1522_s5 + $0x268] sm:$0xff] }
 0x19a   :  { %334 = vst.msk [vmem:[#allocation2 + $0x1] sm:$0x1] %vm250_vm3, %v332_v39  ;;  %350 = vst.msk [vmem:[#allocation2 + $0x5] sm:$0x1] %vm250_vm3, %v249_v40  ;;  %854 = vmatprep.subr.mxu0 %v419_v62  ;;  %v791_v13 = vrot.slane %v1299_v42, 9  ;;  %893 = vmatprep.subr.mxu1 %v449_v16  ;;  %v495_v39 = vld [vmem:[%s1522_s5 + $0x2f0] sm:$0xff] }
 0x19b   :  { %v381_v54 = vrot.slane %v374_v48, %v1221_v0  ;;  %297 = vrot.lane.b32.xlu1 %v789_v44, %s1001_s28  ;;  %v793_v55 = vrot.slane %v341_v50, 9  ;;  %v365_v56 = vcombine.high %v358_v47, %v358_v47  ;;  %343 = vst.msk [vmem:[#allocation2 + $0x3] sm:$0x1] %vm250_vm3, %v341_v50  ;;  %v794_v60 = vrot.slane %v358_v47, 9  ;;  %855 = vmatpush3.msra.mxu0 %v403_v1  ;;  %v479_v40 = vld [vmem:[%s1522_s5 + $0x270] sm:$0xff]  ;;  %v476_v47 = vld [vmem:[%s1522_s5 + $0x258] sm:$0xff] }
 0x19c   :  { %856 = vmatprep.subr.mxu0 %v418_v4  ;;  %894 = vmatpush3.msra.mxu1 %v433_v18  ;;  %v491_v48 = vld [vmem:[%s1522_s5 + $0x2d0] sm:$0xff]  ;;  %v490_v50 = vld [vmem:[%s1522_s5 + $0x2c8] sm:$0xff]  ;;  %v484_v62 = vld [vmem:[%s1522_s5 + $0x298] sm:$0xff] }
 0x19d   :  { %337 = vrot.lane.b32.xlu0 %v792_v49, %s1001_s28  ;;  %v390_v61 = vcombine.high %v381_v54, %v381_v54  ;;  %367 = vst.msk [vmem:[#allocation2 + $0x7] sm:$0x1] %vm250_vm3, %v365_v56  ;;  %383 = vst.msk [vmem:[#allocation2 + $0x9] sm:$0x1] %vm250_vm3, %v381_v54  ;;  %v795_v2 = vrot.slane %v365_v56, 9  ;;  %857 = vmatpush3.msra.mxu0 %v402_v6  ;;  %v796_v17 = vrot.slane %v381_v54, 9 }
 0x19e   :  { %858 = vmatprep.subr.mxu0 %v417_v8  ;;  %v475_v49 = vld [vmem:[%s1522_s5 + $0x250] sm:$0xff]  ;;  %v488_v54 = vld [vmem:[%s1522_s5 + $0x2b8] sm:$0xff]  ;;  %v466_v4 = vld [vmem:[%s1522_s5 + $0x208] sm:$0xff] }
 0x19f   :  { %346 = vrot.lane.b32.xlu1 %v793_v55, %s1001_s28  ;;  %392 = vst.msk [vmem:[#allocation2 + $0xb] sm:$0x1] %vm250_vm3, %v390_v61  ;;  %859 = vmatpush3.msra.mxu0 %v401_v11  ;;  %v797_v19 = vrot.slane %v390_v61, 9  ;;  %v472_v55 = vld [vmem:[%s1522_s5 + $0x238] sm:$0xff]  ;;  %v487_v56 = vld [vmem:[%s1522_s5 + $0x2b0] sm:$0xff]  ;;  %v469_v61 = vld [vmem:[%s1522_s5 + $0x220] sm:$0xff] }
 0x1a0   :  { %898 = vmatprep.subr.mxu0 %v496_v15  ;;  %v483_v1 = vld [vmem:[%s1522_s5 + $0x290] sm:$0xff]  ;;  %v465_v6 = vld [vmem:[%s1522_s5 + $0x200] sm:$0xff] }
 0x1a1   :  { %361 = vrot.lane.b32.xlu0 %v794_v60, %s1001_s28  ;;  %v485_v60 = vld [vmem:[%s1522_s5 + $0x2a0] sm:$0xff] }
 0x1a3   :  { %370 = vrot.lane.b32.xlu1 %v795_v2, %s1001_s28  ;;  %v467_v2 = vld [vmem:[%s1522_s5 + $0x210] sm:$0xff] }
 0x1a5   :  { %312 = vrot.lane.b32.xlu0 %v790_v9, %s1001_s28 }
 0x1a7   :  { %321 = vrot.lane.b32.xlu1 %v791_v13, %s1001_s28 }
 0x1a9   :  { %386 = vrot.lane.b32.xlu0 %v796_v17, %s1001_s28 }
 0x1ab   :  { %395 = vrot.lane.b32.xlu1 %v797_v19, %s1001_s28 }
 0x207   :  { %v263_v20 = vpop.permute.xlu0 %262 }
 0x208   :  { %266 = vst.msk [vmem:[#allocation2] sm:$0x1] %vm265_vm4, %v263_v20 }
 0x209   :  { %v289_v21 = vpop.permute.xlu1 %288 }
 0x20a   :  { %291 = vst.msk [vmem:[#allocation2 + $0x4] sm:$0x1] %vm265_vm4, %v289_v21  ;;  %v800_v21 = vld [vmem:[%s1526_s7] ss:$0 sm:$0xff] }
 0x20b   :  { %v273_v22 = vpop.permute.xlu0 %272 }
 0x20c   :  { %275 = vst.msk [vmem:[#allocation2 + $0x2] sm:$0x1] %vm265_vm4, %v273_v22 }
 0x20d   :  { %v298_v23 = vpop.permute.xlu1 %297 }
 0x20e   :  { %300 = vst.msk [vmem:[#allocation2 + $0x6] sm:$0x1] %vm265_vm4, %v298_v23 }
 0x20f   :  { %v338_v24 = vpop.permute.xlu0 %337 }
 0x210   :  { %340 = vst.msk [vmem:[#allocation2 + $0x1] sm:$0x1] %vm265_vm4, %v338_v24 }
 0x211   :  { %v347_v25 = vpop.permute.xlu1 %346 }
 0x212   :  { %349 = vst.msk [vmem:[#allocation2 + $0x3] sm:$0x1] %vm265_vm4, %v347_v25  ;;  %v801_v25 = vld [vmem:[#allocation3] ss:$0 sm:$0xff] }
 0x213   :  { %v362_v26 = vpop.permute.xlu0 %361 }
 0x214   :  { %364 = vst.msk [vmem:[#allocation2 + $0x5] sm:$0x1] %vm265_vm4, %v362_v26 }
 0x215   :  { %v371_v27 = vpop.permute.xlu1 %370 }
 0x216   :  { %373 = vst.msk [vmem:[#allocation2 + $0x7] sm:$0x1] %vm265_vm4, %v371_v27 }
 0x217   :  { %v313_v28 = vpop.permute.xlu0 %312 }
 0x218   :  { %315 = vst.msk [vmem:[#allocation2 + $0x8] sm:$0x1] %vm265_vm4, %v313_v28 }
 0x219   :  { %v322_v29 = vpop.permute.xlu1 %321 }
 0x21a   :  { %324 = vst.msk [vmem:[#allocation2 + $0xa] sm:$0x1] %vm265_vm4, %v322_v29 }
 0x21b   :  { %v387_v30 = vpop.permute.xlu0 %386 }
 0x21c   :  { %389 = vst.msk [vmem:[#allocation2 + $0x9] sm:$0x1] %vm265_vm4, %v387_v30 }
 0x21d   :  { %v396_v31 = vpop.permute.xlu1 %395  ;;  %v399_v32 = vld [vmem:[#allocation2] sm:$0xff] }
 0x21e   :  { %398 = vst.msk [vmem:[#allocation2 + $0xb] sm:$0x1] %vm265_vm4, %v396_v31  ;;  %v513_v33 = vrot.slane %v399_v32, %v1221_v0  ;;  %v506_v34 = vcombine.high %v399_v32, %v399_v32 }
 0x220   :  { %v521_v35 = vcombine.high %v513_v33, %v513_v33  ;;  %v520_v36 = vrot.slane %v506_v34, %v1221_v0  ;;  %v494_v0 = vld [vmem:[%s1522_s5 + $0x2e8] sm:$0xff] }
 0x222   :  { %601 = vmatprep.mubr.f32.mxu0 %v521_v35  ;;  %v522_v38 = vcombine.high %v520_v36, %v520_v36 }
 0x223   :  { %602 = vmatmul.mubr.f32.vlgmr.msra.gmra.mxu0 %v513_v33 }
 0x224   :  { %899 = vmatpush3.msra.mxu0 %v480_v37  ;;  %671 = vmatprep.mubr.f32.mxu1 %v522_v38 }
 0x225   :  { %900 = vmatprep.subr.mxu0 %v495_v39  ;;  %672 = vmatmul.mubr.f32.vlgmr.msra.gmra.mxu1 %v520_v36  ;;  %v799_v42 = vld.sshfl [vmem:[#allocation2 + $0x8] sm:$0x33 pattern:$0x76325410] }
 0x226   :  { %901 = vmatpush3.msra.mxu0 %v479_v40  ;;  %v530_v44 = vcombine.high %v799_v42, %v799_v42 }
 0x227   :  { %902 = vmatprep.subr.mxu0 %v494_v0 }
 0x228   :  { %903 = vmatpush3.msra.mxu0 %v478_v41  ;;  %741 = vmatprep.mubr.f32.mxu0 %v530_v44 }
 0x229   :  { %904 = vmatprep.subr.mxu0 %v493_v43 }
 0x22a   :  { %905 = vmatpush3.msra.mxu0 %v477_v45 }
 0x22b   :  { %906 = vmatprep.subr.mxu0 %v492_v46 }
 0x22c   :  { %907 = vmatpush3.msra.mxu0 %v476_v47 }
 0x22d   :  { %908 = vmatprep.subr.mxu0 %v491_v48 }
 0x22e   :  { %909 = vmatpush3.msra.mxu0 %v475_v49 }
 0x22f   :  { %910 = vmatprep.subr.mxu0 %v490_v50 }
 0x230   :  { %911 = vmatpush3.msra.mxu0 %v474_v51 }
 0x231   :  { %912 = vmatprep.subr.mxu0 %v489_v52 }
 0x232   :  { %913 = vmatpush3.msra.mxu0 %v473_v53 }
 0x233   :  { %914 = vmatprep.subr.mxu0 %v488_v54 }
 0x234   :  { %915 = vmatpush3.msra.mxu0 %v472_v55 }
 0x235   :  { %916 = vmatprep.subr.mxu0 %v487_v56 }
 0x236   :  { %917 = vmatpush3.msra.mxu0 %v471_v57 }
 0x237   :  { %918 = vmatprep.subr.mxu0 %v486_v58 }
 0x238   :  { %919 = vmatpush3.msra.mxu0 %v470_v59 }
 0x239   :  { %920 = vmatprep.subr.mxu0 %v485_v60 }
 0x23a   :  { %921 = vmatpush3.msra.mxu0 %v469_v61 }
 0x23b   :  { %922 = vmatprep.subr.mxu0 %v484_v62 }
 0x23c   :  { %923 = vmatpush3.msra.mxu0 %v468_v63 }
 0x23d   :  { %924 = vmatprep.subr.mxu0 %v483_v1 }
 0x23e   :  { %925 = vmatpush3.msra.mxu0 %v467_v2 }
 0x23f   :  { %926 = vmatprep.subr.mxu0 %v482_v3 }
 0x240   :  { %927 = vmatpush3.msra.mxu0 %v466_v4 }
 0x241   :  { %928 = vmatprep.subr.mxu0 %v481_v5 }
 0x242   :  { %929 = vmatpush3.msra.mxu0 %v465_v6 }
 0x243   :  { %742 = vmatmul.mubr.f32.vlgmr.msra.gmra.mxu0 %v799_v42 }
 0x2e3   :  { %v860_v8 = vpop.f32.mrf.mxu0 }
 0x2e5   :  { %v861_v9 = vpop.f32.mrf.mxu0  ;;  %v895_v10 = vpop.f32.mrf.mxu1 }
 0x2e6   :  { %v862_v11 = vadd.f32 %v861_v9, %v860_v8 }
 0x2e7   :  { %v896_v13 = vpop.f32.mrf.mxu1 }
 0x2e8   :  { %v604_v14 = vadd.f32 %v862_v11, %v798_v12  ;;  %v897_v15 = vadd.f32 %v896_v13, %v895_v10 }
 0x2ea   :  { %v674_v18 = vadd.f32 %v897_v15, %v604_v14 }
 0x303   :  { %v930_v16 = vpop.f32.mrf.mxu0 }
 0x305   :  { %v931_v17 = vpop.f32.mrf.mxu0 }
 0x306   :  { %v932_v19 = vadd.f32 %v931_v17, %v930_v16 }
 0x308   :  { %v744_v20 = vadd.f32 %v932_v19, %v674_v18 }
 0x30a   :  { %v747_v22 = vmax.f32 %v744_v20, 0.0 }
 0x30c   :  { %v755_v23 = vmul.f32 %v800_v21, %v747_v22 }
 0x30e   :  { %v757_v24 = vsel %vm756_vm5, %v755_v23, 0.0 }
 0x30f   :  { %758 = vadd.xlane.f32.xlu0 %v757_v24 }
 0x398   :  { %v759_v26 = vpop.xlane.xlu0 %758 }
 0x399   :  { %v767_v27 = vadd.f32 %v801_v25, %v759_v26 }
 0x39b   :  { %v802_v28 = vmul.f32 -1.442695, %v767_v27 }
 0x39d   :  { %994 = vpow2.f32 %v802_v28 }
 0x3aa   :  { %v995_v29 = vpop.eup %994 }
 0x3ab   :  { %v771_v30 = vadd.f32 1.0, %v995_v29 }
 0x3ad   :  { %996 = vrcp.f32 %v771_v30 }
 0x3ba   :  { %v997_v31 = vpop.eup %996 }
 0x3bb   :  { %775 = vst.msk [vmem:[%s1527_s9] sm:$0x3] %vm774_vm6, %v997_v31 }

</bundles_post_ra>
